<compile_context>
chip_gen: v6e
topology: v6e:2x2x1
jax: 0.10.0
libtpu: 0.0.40
codegen_flags: <defaults>
</compile_context>

<pallas_src>
import functools

import jax
import jax.numpy as jnp
from jax import lax
from jax.experimental import pallas as pl
from jax.experimental.pallas import tpu as pltpu


def ce_loss_kernel(x_ref, t_ref, o_ref, *, inv_scale, n_rows, tile_n):
    """x_ref/t_ref: (TILE_N, C) tile of logits / target scores; o_ref: (1,1) loss acc."""
    i = pl.program_id(0)

    @pl.when(i == 0)
    def _init():
        o_ref[...] = jnp.zeros_like(o_ref)

    # Cast in-kernel (native dtype is streamed from HBM; cast is a VPU op under the DMA).
    x = x_ref[...].astype(jnp.float32)                 # (TN, C), classes on lanes
    t = t_ref[...].astype(jnp.float32)                 # (TN, C)
    tn, c = x.shape

    # ---- numerically stable logsumexp over classes (lane axis) ----
    m = jnp.max(x, axis=-1, keepdims=True)             # (TN, 1)
    z = x - m
    lse = jnp.log(jnp.sum(jnp.exp(z), axis=-1, keepdims=True))   # (TN, 1)

    # ---- argmax(target, dim=-1), first-index tie-break, without a gather ----
    col = lax.broadcasted_iota(jnp.int32, (tn, c), 1)
    tmax = jnp.max(t, axis=-1, keepdims=True)
    idx = jnp.min(jnp.where(t == tmax, col, c), axis=-1, keepdims=True)    # (TN, 1)

    # ---- NLL per row without materializing log_softmax:  loss = lse - z[idx] ----
    picked_z = jnp.sum(jnp.where(col == idx, z, 0.0), axis=-1, keepdims=True)  # (TN, 1)
    per_row = lse - picked_z                           # (TN, 1)  == -log_softmax(x)[r, idx]

    # ---- mask rows past the true batch size (last partial tile) ----
    row = lax.broadcasted_iota(jnp.int32, (tn, 1), 0) + i * tile_n
    per_row = jnp.where(row < n_rows, per_row, 0.0)

    o_ref[...] += jnp.sum(per_row, keepdims=True)      # (1, 1) partial sum

    @pl.when(i == pl.num_programs(0) - 1)
    def _finalize():
        # reduction: 'mean' -> inv_scale = 1/N, 'sum' -> 1.0 (applied exactly once)
        o_ref[...] = o_ref[...] * inv_scale


def ce_loss(x, target, reduction="mean", max_tile_rows=512):
    # Same validation as the PyTorch module.
    if x.shape[0] != target.shape[0]:
        raise ValueError(
            "Expected input batchsize ({}) to match target batch_size({})".format(
                x.shape[0], target.shape[0]))
    if x.ndim < 2:
        raise ValueError(
            "Expected input tensor to have least 2 dimensions(got {})".format(x.shape[0]))
    if x.ndim != 2:
        raise ValueError(
            "Only 2 dimension tensor are implemented, (got {})".format(x.shape))
    if reduction not in ("mean", "sum"):
        # TODO(synk): reduction='none' (per-sample loss vector output) not implemented.
        raise NotImplementedError("only reduction='mean'/'sum' supported")

    N, C = x.shape
    itemsize = max(jnp.dtype(x.dtype).itemsize, jnp.dtype(target.dtype).itemsize)
    mult = 16 if itemsize < 4 else 8                   # sublane multiple (bf16 packs x2)

    # Cap the row tile so 2 inputs x 2 pipeline buffers stay inside a ~24 MiB budget
    # (safe even on v7x's 64 MiB physical / 32 MiB scoped-default VMEM).
    bytes_per_row = 2 * 2 * C * itemsize
    budget = 24 * 1024 * 1024
    cap = max(mult, (budget // max(bytes_per_row, 1)) // mult * mult)
    max_tile = max(mult, min(int(max_tile_rows), cap))
    max_tile = (max_tile // mult) * mult

    if N <= max_tile:
        tile_n = N                                     # single block == full dim (always legal)
    else:
        tile_n = max_tile                              # multiple of 8 (f32) / 16 (bf16)
    grid = pl.cdiv(N, tile_n)

    inv_scale = 1.0 / N if reduction == "mean" else 1.0
    kernel = functools.partial(ce_loss_kernel, inv_scale=inv_scale,
                               n_rows=N, tile_n=tile_n)

    # Explicit scoped-VMEM limit with headroom over the double-buffered working set.
    working_set = 2 * 2 * tile_n * C * itemsize
    vmem_limit = int(min(64 * 1024 * 1024,
                         max(16 * 1024 * 1024, 2 * working_set + (1 << 20))))

    out = pl.pallas_call(
        kernel,
        out_shape=jax.ShapeDtypeStruct((1, 1), jnp.float32),
        grid_spec=pltpu.PrefetchScalarGridSpec(
            num_scalar_prefetch=0,
            grid=(grid,),
            in_specs=[pl.BlockSpec((tile_n, C), lambda i: (i, 0)),
                      pl.BlockSpec((tile_n, C), lambda i: (i, 0))],
            out_specs=pl.BlockSpec((1, 1), lambda i: (0, 0))),
        compiler_params=pltpu.CompilerParams(
            dimension_semantics=("arbitrary",),        # accumulator carried across the axis
            vmem_limit_bytes=vmem_limit),
    )(x, target)
    return out[0, 0]


def reference_ce_loss(x, target, reduction="mean"):
    """Pure-JAX reference of the PyTorch CELoss forward."""
    logsm = jax.nn.log_softmax(x.astype(jnp.float32), axis=1)
    idx = jnp.argmax(target, axis=-1)
    nll = -jnp.take_along_axis(logsm, idx[:, None], axis=1)[:, 0]
    return jnp.mean(nll) if reduction == "mean" else jnp.sum(nll)


if __name__ == "__main__":
    key = jax.random.PRNGKey(0)
    kx, kt = jax.random.split(key)
    N, C = 20, 32                                      # (batch, num_classes)
    x = jax.random.normal(kx, (N, C), jnp.float32)
    target = jax.random.normal(kt, (N, C), jnp.float32)   # soft scores; argmax -> class

    # f32 path; small max_tile_rows to exercise multi-tile grid + partial-last-tile mask.
    loss = jax.block_until_ready(ce_loss(x, target, max_tile_rows=8))
    ref = reference_ce_loss(x, target)
    err = float(jnp.abs(loss - ref))
    if err > 1e-5:
        raise AssertionError(f"f32 kernel/reference mismatch, abs err = {err}")

    # 'sum' reduction path.
    loss_s = jax.block_until_ready(ce_loss(x, target, reduction="sum", max_tile_rows=8))
    ref_s = reference_ce_loss(x, target, reduction="sum")
    err_s = float(jnp.abs(loss_s - ref_s))
    if err_s > 1e-4:
        raise AssertionError(f"sum kernel/reference mismatch, abs err = {err_s}")

    # bf16 streaming path (native-dtype DMA, cast inside the kernel), looser tolerance.
    xb, tb = x.astype(jnp.bfloat16), target.astype(jnp.bfloat16)
    loss_b = jax.block_until_ready(ce_loss(xb, tb, max_tile_rows=8))
    ref_b = reference_ce_loss(xb.astype(jnp.float32), tb.astype(jnp.float32))
    err_b = float(jnp.abs(loss_b - ref_b))
    if err_b > 5e-2 * max(1.0, abs(float(ref_b))):
        raise AssertionError(f"bf16 kernel/reference mismatch, abs err = {err_b}")

    print("KERNEL_OK")
</pallas_src>

<mosaic_0001>
module attributes {stable_mosaic.version = 11 : i64} {
  func.func @ce_loss_kernel(%arg0: i32, %arg1: memref<8x32xf32, #tpu.memory_space<vmem>>, %arg2: memref<8x32xf32, #tpu.memory_space<vmem>>, %arg3: memref<1x1xf32, #tpu.memory_space<vmem>>) attributes {dimension_semantics = [#tpu.dimension_semantics<arbitrary>], iteration_bounds = array<i64: 3>, scalar_prefetch = 0 : i64, scratch_operands = 0 : i64, tpu.core_type = #tpu.core_type<tc>, window_params = [{transform_indices = @transform_0, window_bounds = array<i64: 8, 32>}, {transform_indices = @transform_1, window_bounds = array<i64: 8, 32>}, {pipeline_mode = #tpu.pipeline_mode<synchronous>, transform_indices = @transform_2, window_bounds = array<i64: 1, 1>}]} {
    %c0_i32 = arith.constant 0 : i32
    %0 = arith.cmpi eq, %arg0, %c0_i32 : i32
    %1 = arith.extui %0 : i1 to i32
    %c0_i32_0 = arith.constant 0 : i32
    %2 = arith.cmpi ne, %1, %c0_i32_0 : i32
    scf.if %2 {
      %cst_16 = arith.constant 0.000000e+00 : f32
      %48 = vector.broadcast %cst_16 : f32 to vector<1x1xf32>
      %c0_17 = arith.constant 0 : index
      %c0_18 = arith.constant 0 : index
      %49 = vector.load %arg3[%c0_17, %c0_18] : memref<1x1xf32, #tpu.memory_space<vmem>>, vector<1x1xf32>
      tpu.vector_store %arg3[%c0_17, %c0_18], %48 {strides = array<i32>} : memref<1x1xf32, #tpu.memory_space<vmem>>, vector<1x1xf32>,
    } else {
    }
    %c0 = arith.constant 0 : index
    %c0_1 = arith.constant 0 : index
    %3 = vector.load %arg1[%c0, %c0_1] : memref<8x32xf32, #tpu.memory_space<vmem>>, vector<8x32xf32>
    %c0_2 = arith.constant 0 : index
    %c0_3 = arith.constant 0 : index
    %4 = vector.load %arg2[%c0_2, %c0_3] : memref<8x32xf32, #tpu.memory_space<vmem>>, vector<8x32xf32>
    %cst = arith.constant dense<0xFF800000> : vector<8xf32>
    %5 = vector.multi_reduction <maximumf>, %3, %cst [1] : vector<8x32xf32> to vector<8xf32>
    %6 = vector.shape_cast %5 : vector<8xf32> to vector<8x1xf32>
    %7 = vector.broadcast %6 : vector<8x1xf32> to vector<8x32xf32>
    %8 = arith.subf %3, %7 : vector<8x32xf32>
    %9 = math.exp %8 : vector<8x32xf32>
    %cst_4 = arith.constant dense<0.000000e+00> : vector<8xf32>
    %10 = vector.multi_reduction <add>, %9, %cst_4 [1] : vector<8x32xf32> to vector<8xf32>
    %11 = vector.shape_cast %10 : vector<8xf32> to vector<8x1xf32>
    %12 = math.log %11 : vector<8x1xf32>
    %13 = tpu.iota {dimensions = array<i32: 1>} : vector<8x32xi32>
    %cst_5 = arith.constant dense<0xFF800000> : vector<8xf32>
    %14 = vector.multi_reduction <maximumf>, %4, %cst_5 [1] : vector<8x32xf32> to vector<8xf32>
    %15 = vector.shape_cast %14 : vector<8xf32> to vector<8x1xf32>
    %16 = vector.broadcast %15 : vector<8x1xf32> to vector<8x32xf32>
    %17 = arith.cmpf oeq, %4, %16 : vector<8x32xf32>
    %c32_i32 = arith.constant 32 : i32
    %18 = vector.broadcast %c32_i32 : i32 to vector<8x32xi32>
    %19 = arith.select %17, %13, %18 : vector<8x32xi1>, vector<8x32xi32>
    %cst_6 = arith.constant dense<2147483647> : vector<8xi32>
    %20 = vector.multi_reduction <minsi>, %19, %cst_6 [1] : vector<8x32xi32> to vector<8xi32>
    %21 = vector.shape_cast %20 : vector<8xi32> to vector<8x1xi32>
    %22 = vector.broadcast %21 : vector<8x1xi32> to vector<8x32xi32>
    %23 = arith.cmpi eq, %13, %22 : vector<8x32xi32>
    %cst_7 = arith.constant 0.000000e+00 : f32
    %24 = vector.broadcast %cst_7 : f32 to vector<8x32xf32>
    %25 = arith.select %23, %8, %24 : vector<8x32xi1>, vector<8x32xf32>
    %cst_8 = arith.constant dense<0.000000e+00> : vector<8xf32>
    %26 = vector.multi_reduction <add>, %25, %cst_8 [1] : vector<8x32xf32> to vector<8xf32>
    %27 = vector.shape_cast %26 : vector<8xf32> to vector<8x1xf32>
    %28 = arith.subf %12, %27 : vector<8x1xf32>
    %29 = tpu.iota {dimensions = array<i32: 0>} : vector<8x1xi32>
    %c8_i32 = arith.constant 8 : i32
    %30 = arith.muli %arg0, %c8_i32 : i32
    %31 = vector.broadcast %30 : i32 to vector<8x1xi32>
    %32 = arith.addi %29, %31 : vector<8x1xi32>
    %c20_i32 = arith.constant 20 : i32
    %33 = vector.broadcast %c20_i32 : i32 to vector<8x1xi32>
    %34 = arith.cmpi slt, %32, %33 : vector<8x1xi32>
    %cst_9 = arith.constant 0.000000e+00 : f32
    %35 = vector.broadcast %cst_9 : f32 to vector<8x1xf32>
    %36 = arith.select %34, %28, %35 : vector<8x1xi1>, vector<8x1xf32>
    %c0_10 = arith.constant 0 : index
    %c0_11 = arith.constant 0 : index
    %37 = vector.load %arg3[%c0_10, %c0_11] : memref<1x1xf32, #tpu.memory_space<vmem>>, vector<1x1xf32>
    %38 = vector.shape_cast %36 : vector<8x1xf32> to vector<1x8x1xf32>
    %cst_12 = arith.constant dense<0.000000e+00> : vector<1xf32>
    %39 = vector.multi_reduction <add>, %38, %cst_12 [1, 2] : vector<1x8x1xf32> to vector<1xf32>
    %40 = vector.shape_cast %39 : vector<1xf32> to vector<1x1x1xf32>
    %41 = vector.extract %40[0, 0, 0] : f32 from vector<1x1x1xf32>
    %42 = vector.broadcast %41 : f32 to vector<1x1xf32>
    %43 = arith.addf %37, %42 : vector<1x1xf32>
    %c0_13 = arith.constant 0 : index
    %c0_14 = arith.constant 0 : index
    %44 = vector.load %arg3[%c0_13, %c0_14] : memref<1x1xf32, #tpu.memory_space<vmem>>, vector<1x1xf32>
    tpu.vector_store %arg3[%c0_13, %c0_14], %43 {strides = array<i32>} : memref<1x1xf32, #tpu.memory_space<vmem>>, vector<1x1xf32>,
    %c2_i32 = arith.constant 2 : i32
    %45 = arith.cmpi eq, %arg0, %c2_i32 : i32
    %46 = arith.extui %45 : i1 to i32
    %c0_i32_15 = arith.constant 0 : i32
    %47 = arith.cmpi ne, %46, %c0_i32_15 : i32
    scf.if %47 {
      %c0_16 = arith.constant 0 : index
      %c0_17 = arith.constant 0 : index
      %48 = vector.load %arg3[%c0_16, %c0_17] : memref<1x1xf32, #tpu.memory_space<vmem>>, vector<1x1xf32>
      %cst_18 = arith.constant 5.000000e-02 : f32
      %49 = vector.broadcast %cst_18 : f32 to vector<1x1xf32>
      %50 = arith.mulf %48, %49 : vector<1x1xf32>
      %c0_19 = arith.constant 0 : index
      %c0_20 = arith.constant 0 : index
      %51 = vector.load %arg3[%c0_19, %c0_20] : memref<1x1xf32, #tpu.memory_space<vmem>>, vector<1x1xf32>
      tpu.vector_store %arg3[%c0_19, %c0_20], %50 {strides = array<i32>} : memref<1x1xf32, #tpu.memory_space<vmem>>, vector<1x1xf32>,
    } else {
    }
    return
  }
  func.func @transform_0(%arg0: i32) -> (i32, i32) {
    %c0_i32 = arith.constant 0 : i32
    %c0_i32_0 = arith.constant 0 : i32
    return %arg0, %c0_i32 : i32, i32
  }
  func.func @transform_1(%arg0: i32) -> (i32, i32) {
    %c0_i32 = arith.constant 0 : i32
    %c0_i32_0 = arith.constant 0 : i32
    return %arg0, %c0_i32 : i32, i32
  }
  func.func @transform_2(%arg0: i32) -> (i32, i32) {
    %c0_i32 = arith.constant 0 : i32
    %c0_i32_0 = arith.constant 0 : i32
    %c0_i32_1 = arith.constant 0 : i32
    return %c0_i32, %c0_i32_0 : i32, i32
  }
}

</mosaic_0001>

<bundles_post_ra>
// kernel: tpu_custom_call.1
= control target key start
LH: loop header
LB: loop body
LE: loop exit
PB: predicated region body
PF: predicated region fallthrough
CT: control target
= control target key end

     0   :  { %7 = vsyncpa [#allocation3], 0  ;;  %s727_s0 = inlined_call_operand.hbm [shape: f32[20,32], index: 0, kind: input, shape index: {}]   ;;  %s728_s1 = inlined_call_operand.hbm [shape: f32[20,32], index: 1, kind: input, shape index: {}]   ;;  %s729_s2 = inlined_call_operand.hbm [shape: f32[1,1], index: 2, kind: output, shape index: {}]  }
   0x1   :  { %9 = vsyncpa [#allocation3 + $0x1], 0 }
   0x2   :  { %10 = vsyncpa [#allocation6], 0 }
   0x3   :  { %12 = vsyncpa [#allocation6 + $0x1], 0 }
   0x4   :  { %13 = vsyncpa [#allocation4], 0  ;;  %s560_s9 = smov 0   ;;  %s562_s10 = smov 0  }
   0x5   :  { %s564_s11 = smov 0   ;;  %s566_s12 = smov 0  }
   0x6 LB: > { %s579_s13 = sadd.s32 4294967295, %s539_s12   ;;  %s582_s14 = sadd.s32 1, %s539_s12   ;;  %s539_s12 = sphi %s566_s12, %s741_s12   ;;  %s535_s11 = sphi %s564_s11, %s740_s11   ;;  %s531_s10 = sphi %s562_s10, %s739_s10   ;;  %s527_s9 = sphi %s560_s9, %s738_s9  }
   0x7   : > { %s23_s15 = ssub.s32 %s539_s12, %s582_s14  ;;  %s26_s16 = sadd.s32 1, %s535_s11 }
   0x8   : > { %p24_p0 = scmp.eq.s32.totalorder %s23_s15, 0  ;;  %p33_p1 = scmp.ne.s32.totalorder %s535_s11, %s531_s10 }
   0x9   : > { %p34_p2 = scmp.eq.s32.totalorder %s539_s12, 0  ;;  %p39_p3 = scmp.ne.s32.totalorder %s531_s10, %s527_s9 }
   0xa   : > { %s592_s17 = scalar_select %p24_p0, %s535_s11, %s26_s16  }
   0xb   : > { %p35_p4 = por %p34_p2, %p33_p1  ;;  %p40_p5 = scmp.eq.s32.totalorder %s579_s13, 0 }
   0xc   : > { %p376_p6 = scmp.lt.s32.totalorder %s539_s12, 3  ;;  %s601_s19 = sand.u32 1, %s535_s11  }
   0xd   : > { %p596_p7 = por %p40_p5, %p39_p3  ;;  %s345_s20 = sshll.u32 %s601_s19, 3 }
   0xe   : > { %s346_s21 = sshll.u32 %s539_s12, 7  ;;  %s114_s25 = scalar_lea.vmem [#allocation2], %s345_s20 }
   0xf   : > { %s731_s18 = scalar_select %p596_p7, 1, 0 }
  0x10   : > { %s610_s24 = scalar_lea.hbm %s727_s0, %s346_s21  ;;  %s121_s26 = sshll.u32 %s114_s25, 4  ;;  %s614_s26 = int_to_ptr.vmem [resolvable:$true] %s121_s26 }
  0x11   : > { %p616_p8 = pnand %p376_p6, %p35_p4  ;;  %s111_s28 = scalar_lea.sflag [#allocation3], %s601_s19 }
  0x12   : > { %s417_s29 = scalar_lea.hbm %s610_s24, 128  ;;  %s422_s4 = scalar_lea.hbm %s727_s0, 384 }
  0x13   : > { %p418_p11 = scmp.ne.s32.totalorder %s610_s24, %s417_s29  ;;  %p419_p12 = pneg %p616_p8 }
  0x14   : > { %p423_p1 = scmp.lt.s32.totalorder %s610_s24, %s727_s0  ;;  %p424_p2 = scmp.lt.s32.totalorder %s422_s4, %s417_s29 }
  0x15   : > { %p420_p13 = pnand %p419_p12, %p418_p11 }
  0x16   : > { %p425_p3 = por %p424_p2, %p423_p1 }
  0x17   : > { %p421_p0 = pneg %p420_p13 }
  0x19   : > { %p426_p4 = pnand %p425_p3, %p421_p0 }
  0x1b   : > { %429 = shalt.err (!%p426_p4)
}
  0x1c   : > { %s430_s7 = scalar_lea.vmem %s614_s26, 128  ;;  %s541_s8 = smov [#allocation2]  }
  0x1d   : > { %p431_p5 = scmp.ne.s32.totalorder %s614_s26, %s430_s7  ;;  %s435_s9 = sshll.u32 %s541_s8, 4  ;;  %s436_s9 = int_to_ptr.vmem [resolvable:$false] %s435_s9 }
  0x1e   : > { %s437_s15 = scalar_lea.vmem %s436_s9, 256  ;;  %p438_p13 = scmp.lt.s32.totalorder %s614_s26, %s436_s9 }
  0x1f   : > { %p433_p6 = pnand %p431_p5, %p419_p12  ;;  %p439_p9 = scmp.lt.s32.totalorder %s437_s15, %s430_s7 }
  0x21   : > { %p434_p11 = pneg %p433_p6  ;;  %p440_p10 = por %p439_p9, %p438_p13 }
  0x23   : > { %p441_p1 = pnand %p440_p10, %p434_p11 }
  0x25   : > { %444 = shalt.err (!%p441_p1)
}
  0x26   : > { %372 = dma.hbm_to_vmem [thread:$0]  (!%p616_p8), %s610_s24, 128, %s614_s26, %s111_s28  }
  0x27   : > { %p733_p0 = scmp.lt.s32.totalorder %s539_s12, 4  ;;  %p734_p2 = scmp.ge.s32.totalorder %s539_s12, 1 }
  0x28   : > { %s660_s25 = scalar_lea.hbm %s728_s1, %s346_s21  ;;  %s132_s29 = scalar_lea.vmem [#allocation5], %s345_s20 }
  0x29   : > { %p651_p3 = pnand %p734_p2, %p733_p0  ;;  %s139_s30 = sshll.u32 %s132_s29, 4  ;;  %s140_s30 = int_to_ptr.vmem [resolvable:$true] %s139_s30 }
  0x2a   : > { %s129_s24 = scalar_lea.sflag [#allocation6], %s601_s19  ;;  %s445_s26 = scalar_lea.hbm %s660_s25, 128 }
  0x2b   : > { %s735_s16 = scalar_select %p651_p3, 1, 0 }
  0x2c   : > { %p446_p9 = scmp.ne.s32.totalorder %s660_s25, %s445_s26  ;;  %s450_s3 = scalar_lea.hbm %s728_s1, 384 }
  0x2d   : > { %p451_p5 = scmp.lt.s32.totalorder %s660_s25, %s728_s1  ;;  %p452_p6 = scmp.lt.s32.totalorder %s450_s3, %s445_s26 }
  0x2e   : > { %p448_p10 = pnand %p446_p9, %p419_p12 }
  0x2f   : > { %p453_p11 = por %p452_p6, %p451_p5 }
  0x30   : > { %p449_p4 = pneg %p448_p10 }
  0x32   : > { %p454_p13 = pnand %p453_p11, %p449_p4 }
  0x34   : > { %457 = shalt.err (!%p454_p13)
}
  0x35   : > { %s458_s20 = scalar_lea.vmem %s140_s30, 128  ;;  %s542_s19 = smov [#allocation5]  }
  0x36   : > { %p459_p1 = scmp.ne.s32.totalorder %s140_s30, %s458_s20  ;;  %s463_s5 = sshll.u32 %s542_s19, 4  ;;  %s464_s5 = int_to_ptr.vmem [resolvable:$false] %s463_s5 }
  0x37   : > { %s465_s6 = scalar_lea.vmem %s464_s5, 256  ;;  %p466_p9 = scmp.lt.s32.totalorder %s140_s30, %s464_s5 }
  0x38   : > { %p461_p0 = pnand %p459_p1, %p419_p12  ;;  %p467_p10 = scmp.lt.s32.totalorder %s465_s6, %s458_s20 }
  0x3a   : > { %p462_p2 = pneg %p461_p0  ;;  %p468_p7 = por %p467_p10, %p466_p9 }
  0x3c   : > { %p469_p3 = pnand %p468_p7, %p462_p2 }
  0x3e   : > { %472 = shalt.err (!%p469_p3)
}
  0x3f   : > { %375 = dma.hbm_to_vmem [thread:$0]  (!%p616_p8), %s660_s25, 128, %s140_s30, %s129_s24  }
  0x40   : > { %p736_p4 = scmp.ne.s32.totalorder %s735_s16, 0 }
  0x41   : > { %s150_s7 = sand.u32 (!%p736_p4), 1, %s531_s10   ;;  %p737_p12 = scmp.ne.s32.totalorder (!%p736_p4), %s731_s18, 0 }
  0x42   : > { %148 = sbr.rel (%p736_p4) target bundleno = 886 (0x376), region = 28  ;;  %s350_s8 = sshll.u32 (!%p736_p4), %s150_s7, 3 }
  0x43   : > { %s151_s9 = scalar_lea.sflag (!%p736_p4), [#allocation3], %s150_s7  ;;  %s154_s15 = scalar_lea.vmem (!%p736_p4), [#allocation2], %s350_s8 }
  0x47   : > { %514 = dma.done.wait (%p737_p12), %s151_s9, 128  }
  0x48   : > { %516 = vsyncadd (%p737_p12), %s151_s9, 4294967168  ;;  %s160_s22 = scalar_lea.sflag [#allocation6], %s150_s7  ;;  %s163_s23 = scalar_lea.vmem [#allocation5], %s350_s8 }
  0x49   : > { %518 = dma.done.wait (%p737_p12), %s160_s22, 128  }
  0x4a   : > { %520 = vsyncadd (%p737_p12), %s160_s22, 4294967168  ;;  %p352_p7 = scmp.ne.s32.totalorder %s579_s13, 0 }
  0x4c   : > { %187 = sbr.rel (%p352_p7) target bundleno = 83 (0x53), region = 40 }
  0x51   : > { %vm188_vm0 = vcmask 0   ;;  %v543_v0 = vmov 0.0  }
  0x52   : > { %189 = vst.msk [vmem:[#allocation7] sm:$0x1] %vm188_vm0, %v543_v0 }
  0x53 PF: > { %v191_v1 = vld [vmem:[%s163_s23] sm:$0xff]  ;;  %vm192_vm1 = vcmask 261120   ;;  %v190_v3 = vld [vmem:[%s154_s15] sm:$0xff]  ;;  %v204_v5 = vlaneseq  ;;  %s353_s18 = sshll.u32 %s579_s13, 3  ;;  %vm240_vm6 = vcmask 7168   ;;  %vm253_vm7 = vcmask 0  }
  0x54   : > { %v206_v2 = vsel %vm192_vm1, %v191_v1, -inf  ;;  %v193_v4 = vsel %vm192_vm1, %v190_v3, -inf  ;;  %v235_v30 = vstv %s353_s18  ;;  %p354_p8 = scmp.ne.s32.totalorder %s579_s13, 2 }
  0x55   : > { %207 = vmax.xlane.f32.xlu0 %v206_v2  ;;  %194 = vmax.xlane.f32.xlu1 %v193_v4  ;;  %v205_v6 = vand.u32 127, %v204_v5  ;;  %v233_v29 = vshrl.u32 %v204_v5, 7 }
  0x57   : > { %v236_v32 = vadd.s32 %v235_v30, %v233_v29 }
  0x59   : > { %vm237_vm5 = vcmp.lt.s32.totalorder %v236_v32, 20  ;;  %v239_v45 = vld [vmem:[#allocation7] sm:$0x1] }
  0xde   : > { %v208_v7 = vpop.xlane.xlu0 %207  ;;  %v195_v12 = vpop.xlane.xlu1 %194 }
  0xdf   : > { %vm209_vm2 = vcmp.eq.f32.partialorder %v191_v1, %v208_v7  ;;  %v196_v13 = vsub.f32 %v190_v3, %v195_v12 }
  0xe0   : > { %v210_v8 = vsel %vm209_vm2, %v205_v6, 32 }
  0xe1   : > { %v211_v9 = vsel %vm192_vm1, %v210_v8, 2147483647  ;;  %v197_v14 = vmul.f32 1.442695, %v196_v13 }
  0xe2   : > { %v213_v10 = vshra.s32 %v211_v9, 16  ;;  %v212_v17 = vand.u32 65535, %v211_v9 }
  0xe3   : > { %413 = vpow2.f32 %v197_v14 }
  0xe4   : > { %v215_v11 = vcvt.s32.f32 %v213_v10  ;;  %v214_v19 = vcvt.s32.f32 %v212_v17 }
  0xe6   : > { %216 = vmin.xlane.f32.xlu0 %v215_v11 }
  0xf0   : > { %v414_v15 = vpop.eup %413 }
  0xf1   : > { %v199_v16 = vsel %vm192_vm1, %v414_v15, 0.0 }
  0xf2   : > { %200 = vadd.xlane.f32.xlu0 %v199_v16 }
 0x16f   : > { %v217_v18 = vpop.xlane.xlu0 %216 }
 0x170   : > { %vm218_vm3 = vcmp.eq.f32.partialorder %v215_v11, %v217_v18  ;;  %v223_v21 = vcvt.f32.s32 %v217_v18 }
 0x171   : > { %v219_v20 = vsel %vm218_vm3, %v214_v19, inf }
 0x172   : > { %220 = vmin.xlane.f32.xlu1 %v219_v20  ;;  %v224_v23 = vshll.u32 %v223_v21, 16 }
 0x17b   : > { %v201_v28 = vpop.xlane.xlu0 %200 }
 0x17c   : > { %415 = vlog2.f32 %v201_v28 }
 0x189   : > { %v416_v31 = vpop.eup %415 }
 0x18a   : > { %v203_v33 = vmul.f32 0.6931472, %v416_v31 }
 0x1fb   : > { %v221_v22 = vpop.xlane.xlu1 %220 }
 0x1fc   : > { %v222_v24 = vcvt.f32.s32 %v221_v22 }
 0x1fe   : > { %v225_v25 = vadd.s32 %v224_v23, %v222_v24 }
 0x200   : > { %vm226_vm4 = vcmp.eq.s32.totalorder %v205_v6, %v225_v25 }
 0x201   : > { %v227_v26 = vsel %vm226_vm4, %v196_v13, 0.0 }
 0x202   : > { %v228_v27 = vsel %vm192_vm1, %v227_v26, 0.0 }
 0x203   : > { %229 = vadd.xlane.f32.xlu1 %v228_v27 }
 0x28c   : > { %v230_v34 = vpop.xlane.xlu1 %229 }
 0x28d   : > { %v231_v35 = vsub.f32 %v203_v33, %v230_v34 }
 0x28f   : > { %v238_v36 = vsel %vm237_vm5, %v231_v35, 0.0 }
 0x290   : > { %v241_v37 = vsel %vm240_vm6, %v238_v36, 0.0 }
 0x291   : > { %242 = vadd.xlane.f32.xlu0 %v241_v37 }
 0x31a   : > { %v243_v38 = vpop.xlane.xlu0 %242 }
 0x31b   : > { %v244_v39 = vrot.slane %v243_v38, 4 }
 0x31d   : > { %v245_v40 = vadd.f32 %v244_v39, %v243_v38 }
 0x31f   : > { %v246_v41 = vrot.slane %v245_v40, 2 }
 0x321   : > { %v247_v42 = vadd.f32 %v246_v41, %v245_v40 }
 0x323   : > { %v248_v43 = vrot.slane %v247_v42, 1 }
 0x325   : > { %v249_v44 = vadd.f32 %v248_v43, %v247_v42 }
 0x327   : > { %359 = vpush %v249_v44 }
 0x358   : > { %s360_s27 = spop %359  ;;  %258 = sbr.rel (%p354_p8) target bundleno = 871 (0x367), region = 44 }
 0x359   : > { %v251_v46 = vstv %s360_s27 }
 0x35a   : > { %v252_v47 = vadd.f32 %v251_v46, %v239_v45 }
 0x35c   : > { %254 = vst.msk [vmem:[#allocation7] sm:$0x1] %vm253_vm7, %v252_v47 }
 0x363   : > { %v259_v48 = vld [vmem:[#allocation7] sm:$0x1] }
 0x364   : > { %v260_v49 = vmul.f32 0.05, %v259_v48 }
 0x366   : > { %261 = vst.msk [vmem:[#allocation7] sm:$0x1] %vm253_vm7, %v260_v49 }
 0x367 PF: > { %p377_p3 = scmp.eq.s32.totalorder %s579_s13, 2  ;;  %s544_s16 = smov [#allocation7]  }
 0x368   : > { %s269_s25 = sshll.u32 %s544_s16, 4  ;;  %s270_s25 = int_to_ptr.vmem [resolvable:$true] %s269_s25 }
 0x369   : > { %s473_s29 = scalar_lea.vmem %s270_s25, 16  ;;  %s479_s30 = scalar_lea.vmem %s270_s25, 32 }
 0x36a   : > { %p474_p5 = scmp.ne.s32.totalorder %s270_s25, %s473_s29  ;;  %p480_p13 = scmp.lt.s32.totalorder %s270_s25, %s270_s25 }
 0x36b   : > { %p481_p1 = scmp.lt.s32.totalorder %s479_s30, %s473_s29 }
 0x36c   : > { %p475_p6 = pnand %p474_p5, %p377_p3 }
 0x36d   : > { %p482_p0 = por %p481_p1, %p480_p13 }
 0x36e   : > { %p476_p11 = pneg %p475_p6 }
 0x370   : > { %p483_p2 = pnand %p482_p0, %p476_p11 }
 0x372   : > { %486 = shalt.err (!%p483_p2)
}
 0x373   : > { %366 = dma.vmem_to_hbm [thread:$0]  (%p377_p3), %s270_s25, 16, %s729_s2, [#allocation4]  }
 0x374   : > { %522 = dma.done.wait (%p377_p3), [#allocation4], 16  }
 0x375   : > { %524 = vsyncadd (%p377_p3), [#allocation4], 4294967280 }
 0x376 PF: > { %p16_p9 = scmp.ge.s32.totalorder %s582_s14, 5   ;;  %s738_s9 = smov %s531_s10 }
 0x377   : > { %s739_s10 = smov %s535_s11  ;;  %s740_s11 = smov %s592_s17 }
 0x378   : > { %s741_s12 = smov %s582_s14  ;;  %18 = sbr.rel (!%p16_p9) target bundleno = 6 (0x6), region = 86 }
 0x37d   :  { %282 = vsyncpa [#allocation3], 1 }
 0x37e   :  { %284 = vsyncpa [#allocation3 + $0x1], 1 }
 0x37f   :  { %285 = vsyncpa [#allocation6], 1 }
 0x380   :  { %287 = vsyncpa [#allocation6 + $0x1], 1 }
 0x381   :  { %288 = vsyncpa [#allocation4], 1 }
 0x382   :  { %290 = vsyncpa [#allocation4 + $0x1], 1 }

</bundles_post_ra>
